<compile_context>
chip_gen: v5e
topology: v5e:2x2
jax: 0.10.0
libtpu: 0.0.40
codegen_flags: <defaults>
</compile_context>

<pallas_src>
import jax
import jax.numpy as jnp
from jax.experimental import pallas as pl
from jax.experimental.pallas import tpu as pltpu


# ------------------------------ Pallas kernel ------------------------------

def se_kernel(x_ref, w1_ref, b1_ref, w2_ref, b2_ref, o_ref):
    """One block of B samples: out = x * sigmoid(W2 @ relu(W1 @ mean(x) + b1) + b2)."""
    B, C, HW = x_ref.shape
    inv_hw = 1.0 / HW

    # --- Squeeze: global average pool on the MXU (ones-vector matmul), f32 acc.
    ones = jnp.ones((HW, 1), x_ref.dtype)
    cols = [jnp.dot(x_ref[b], ones, preferred_element_type=jnp.float32)
            for b in range(B)]                                      # B x (C, 1)
    s = jnp.concatenate(cols, axis=1) * inv_hw                       # (C, B) f32

    # --- Excitation: the two 1x1 convs as real matmuls over the sample block;
    # channels stay on sublanes, accumulation in f32.
    w1 = w1_ref[...].astype(jnp.float32)                             # (Cr, C)
    w2 = w2_ref[...].astype(jnp.float32)                             # (C, Cr)
    h = jnp.maximum(
        jnp.dot(w1, s, preferred_element_type=jnp.float32)
        + b1_ref[...].astype(jnp.float32), 0.0)                      # (Cr, B)
    g = jax.nn.sigmoid(
        jnp.dot(w2, h, preferred_element_type=jnp.float32)
        + b2_ref[...].astype(jnp.float32))                           # (C, B)
    g = g.astype(x_ref.dtype)

    # --- Scale: canonical (C, 1)-column lane-broadcast over the spatial axis.
    # Re-index x_ref so the full tile is never live across the gate phase.
    for b in range(B):
        o_ref[b] = (x_ref[b] * g[:, b:b + 1]).astype(o_ref.dtype)


# -------------------------------- wrapper -----------------------------------

_MAX_BLOCK_BATCH = 8                   # cap the in-kernel unroll over samples
_VMEM_DATA_BUDGET = 32 * 1024 * 1024   # x-in + x-out, double-buffered
_VMEM_LIMIT_BYTES = 48 * 1024 * 1024   # explicit scoped-VMEM limit (fits v7x 64 MiB)


def _pick_block_batch(n, per_sample_bytes):
    """Largest divisor of n that fits the VMEM budget; prefer >= 2 grid steps."""
    max_b = min(_MAX_BLOCK_BATCH,
                max(1, _VMEM_DATA_BUDGET // (4 * per_sample_bytes)))
    divisors = [d for d in range(1, n + 1) if n % d == 0 and d <= max_b]
    pipelined = [d for d in divisors if n // d >= 2]
    return max(pipelined or divisors or [1])


@jax.jit
def se_layer(x_nchw, params):
    """Pallas forward of SELayer. Input/Output are NCHW (PyTorch convention)."""
    N, C, H, W = x_nchw.shape
    HW = H * W
    x3 = x_nchw.reshape(N, C, HW)                       # pure view, no copy

    w1 = params["w1"]                                   # (Cr, C)  = conv1 1x1 weight
    b1 = params["b1"].reshape(-1, 1)                    # (Cr, 1)
    w2 = params["w2"]                                   # (C, Cr)  = conv2 1x1 weight
    b2 = params["b2"].reshape(-1, 1)                    # (C, 1)
    Cr = w1.shape[0]

    itemsize = jnp.dtype(x3.dtype).itemsize
    per_sample_bytes = C * HW * itemsize
    if 4 * per_sample_bytes > _VMEM_DATA_BUDGET:
        # TODO(synk): two-phase (tiled pool+gate, then tiled scale) path for
        # feature maps whose single-sample (C, HW) tile exceeds VMEM.
        raise NotImplementedError(
            "single-sample (C, HW) tile exceeds the VMEM budget; "
            "two-pass SE kernel not implemented yet")
    B = _pick_block_batch(N, per_sample_bytes)

    flops = 3 * N * C * HW + 4 * N * C * Cr             # pool + scale + gate MLP
    bytes_accessed = (2 * N * C * HW + 2 * C * Cr + C + Cr) * itemsize

    out = pl.pallas_call(
        se_kernel,
        out_shape=jax.ShapeDtypeStruct((N, C, HW), x3.dtype),
        grid_spec=pltpu.PrefetchScalarGridSpec(
            num_scalar_prefetch=0,
            grid=(N // B,),
            in_specs=[
                pl.BlockSpec((B, C, HW), lambda n: (n, 0, 0)),    # x block
                pl.BlockSpec((Cr, C), lambda n: (0, 0)),          # W1 (grid-invariant)
                pl.BlockSpec((Cr, 1), lambda n: (0, 0)),          # b1
                pl.BlockSpec((C, Cr), lambda n: (0, 0)),          # W2
                pl.BlockSpec((C, 1), lambda n: (0, 0)),           # b2
            ],
            out_specs=pl.BlockSpec((B, C, HW), lambda n: (n, 0, 0)),
        ),
        compiler_params=pltpu.CompilerParams(
            dimension_semantics=("parallel",),
            vmem_limit_bytes=_VMEM_LIMIT_BYTES),
        cost_estimate=pl.CostEstimate(
            flops=flops, transcendentals=N * C, bytes_accessed=bytes_accessed),
    )(x3, w1, b1, w2, b2)

    return out.reshape(N, C, H, W)


# --------------------------- pure-JAX reference ------------------------------

def reference_se(x, params):
    w1, b1, w2, b2 = params["w1"], params["b1"], params["w2"], params["b2"]
    s = jnp.mean(x, axis=(2, 3))                        # (N, C)   global avg pool
    h = jnp.maximum(s @ w1.T + b1, 0.0)                 # (N, Cr)  1x1 conv + ReLU
    g = jax.nn.sigmoid(h @ w2.T + b2)                   # (N, C)   1x1 conv + sigmoid
    return x * g[:, :, None, None]


# ----------------------------------- main ------------------------------------

if __name__ == "__main__":
    key = jax.random.PRNGKey(0)
    kx, k1, k2, k3, k4 = jax.random.split(key, 5)

    N, C, H, W = 4, 32, 16, 16
    reduction = 16                                      # module default
    Cr = C // reduction

    f = jnp.float32
    x = jax.random.normal(kx, (N, C, H, W), f)
    params = {
        "w1": 0.3 * jax.random.normal(k1, (Cr, C), f),  # Conv2d(C, C//r, 1) weight
        "b1": 0.1 * jax.random.normal(k2, (Cr,), f),
        "b2": 0.1 * jax.random.normal(k4, (C,), f),
        "w2": 0.3 * jax.random.normal(k3, (C, Cr), f),  # Conv2d(C//r, C, 1) weight
    }

    out = jax.block_until_ready(se_layer(x, params))
    ref = jax.block_until_ready(reference_se(x, params))

    assert out.shape == ref.shape, (out.shape, ref.shape)
    assert jnp.allclose(out, ref, rtol=1e-3, atol=1e-3), \
        float(jnp.max(jnp.abs(out - ref)))

    print("KERNEL_OK")
</pallas_src>

<mosaic_0001>
module attributes {stable_mosaic.version = 11 : i64} {
  func.func @se_kernel(%arg0: i32, %arg1: memref<2x32x256xf32, #tpu.memory_space<vmem>>, %arg2: memref<2x32xf32, #tpu.memory_space<vmem>>, %arg3: memref<2x1xf32, #tpu.memory_space<vmem>>, %arg4: memref<32x2xf32, #tpu.memory_space<vmem>>, %arg5: memref<32x1xf32, #tpu.memory_space<vmem>>, %arg6: memref<2x32x256xf32, #tpu.memory_space<vmem>>) attributes {dimension_semantics = [#tpu.dimension_semantics<parallel>], iteration_bounds = array<i64: 2>, scalar_prefetch = 0 : i64, scratch_operands = 0 : i64, tpu.core_type = #tpu.core_type<tc>, window_params = [{transform_indices = @transform_0, window_bounds = array<i64: 2, 32, 256>}, {pipeline_mode = #tpu.pipeline_mode<synchronous>, transform_indices = @transform_1, window_bounds = array<i64: 2, 32>}, {pipeline_mode = #tpu.pipeline_mode<synchronous>, transform_indices = @transform_2, window_bounds = array<i64: 2, 1>}, {pipeline_mode = #tpu.pipeline_mode<synchronous>, transform_indices = @transform_3, window_bounds = array<i64: 32, 2>}, {pipeline_mode = #tpu.pipeline_mode<synchronous>, transform_indices = @transform_4, window_bounds = array<i64: 32, 1>}, {transform_indices = @transform_5, window_bounds = array<i64: 2, 32, 256>}]} {
    %cst = arith.constant 1.000000e+00 : f32
    %0 = vector.broadcast %cst : f32 to vector<256x1xf32>
    %c0 = arith.constant 0 : index
    %c0_0 = arith.constant 0 : index
    %c0_1 = arith.constant 0 : index
    %1 = vector.load %arg1[%c0, %c0_0, %c0_1] : memref<2x32x256xf32, #tpu.memory_space<vmem>>, vector<1x32x256xf32>
    %2 = vector.shape_cast %1 : vector<1x32x256xf32> to vector<32x256xf32>
    %cst_2 = arith.constant dense<0.000000e+00> : vector<32x1xf32>
    %3 = tpu.matmul %2, %0, %cst_2 {dimension_numbers = #tpu.dot_dimension_numbers<[1], [0], [0], [1], [0, 0, 1, 1], [], []>} : vector<32x256xf32>, vector<256x1xf32>, vector<32x1xf32> -> vector<32x1xf32>
    %c1 = arith.constant 1 : index
    %c0_3 = arith.constant 0 : index
    %c0_4 = arith.constant 0 : index
    %4 = vector.load %arg1[%c1, %c0_3, %c0_4] : memref<2x32x256xf32, #tpu.memory_space<vmem>>, vector<1x32x256xf32>
    %5 = vector.shape_cast %4 : vector<1x32x256xf32> to vector<32x256xf32>
    %cst_5 = arith.constant dense<0.000000e+00> : vector<32x1xf32>
    %6 = tpu.matmul %5, %0, %cst_5 {dimension_numbers = #tpu.dot_dimension_numbers<[1], [0], [0], [1], [0, 0, 1, 1], [], []>} : vector<32x256xf32>, vector<256x1xf32>, vector<32x1xf32> -> vector<32x1xf32>
    %7 = tpu.concatenate %3, %6 in 1 : vector<32x1xf32>, vector<32x1xf32> -> vector<32x2xf32>
    %cst_6 = arith.constant 3.906250e-03 : f32
    %8 = vector.broadcast %cst_6 : f32 to vector<32x2xf32>
    %9 = arith.mulf %7, %8 : vector<32x2xf32>
    %c0_7 = arith.constant 0 : index
    %c0_8 = arith.constant 0 : index
    %10 = vector.load %arg2[%c0_7, %c0_8] : memref<2x32xf32, #tpu.memory_space<vmem>>, vector<2x32xf32>
    %c0_9 = arith.constant 0 : index
    %c0_10 = arith.constant 0 : index
    %11 = vector.load %arg4[%c0_9, %c0_10] : memref<32x2xf32, #tpu.memory_space<vmem>>, vector<32x2xf32>
    %cst_11 = arith.constant dense<0.000000e+00> : vector<2x2xf32>
    %12 = tpu.matmul %10, %9, %cst_11 {dimension_numbers = #tpu.dot_dimension_numbers<[1], [0], [0], [1], [0, 0, 1, 1], [], []>} : vector<2x32xf32>, vector<32x2xf32>, vector<2x2xf32> -> vector<2x2xf32>
    %c0_12 = arith.constant 0 : index
    %c0_13 = arith.constant 0 : index
    %13 = vector.load %arg3[%c0_12, %c0_13] : memref<2x1xf32, #tpu.memory_space<vmem>>, vector<2x1xf32>
    %14 = vector.broadcast %13 : vector<2x1xf32> to vector<2x2xf32>
    %15 = arith.addf %12, %14 : vector<2x2xf32>
    %cst_14 = arith.constant 0.000000e+00 : f32
    %16 = vector.broadcast %cst_14 : f32 to vector<2x2xf32>
    %17 = arith.maximumf %15, %16 : vector<2x2xf32>
    %cst_15 = arith.constant dense<0.000000e+00> : vector<32x2xf32>
    %18 = tpu.matmul %11, %17, %cst_15 {dimension_numbers = #tpu.dot_dimension_numbers<[1], [0], [0], [1], [0, 0, 1, 1], [], []>} : vector<32x2xf32>, vector<2x2xf32>, vector<32x2xf32> -> vector<32x2xf32>
    %c0_16 = arith.constant 0 : index
    %c0_17 = arith.constant 0 : index
    %19 = vector.load %arg5[%c0_16, %c0_17] : memref<32x1xf32, #tpu.memory_space<vmem>>, vector<32x1xf32>
    %20 = vector.broadcast %19 : vector<32x1xf32> to vector<32x2xf32>
    %21 = arith.addf %18, %20 : vector<32x2xf32>
    %22 = arith.negf %21 : vector<32x2xf32>
    %23 = math.exp %22 : vector<32x2xf32>
    %cst_18 = arith.constant 1.000000e+00 : f32
    %24 = vector.broadcast %cst_18 : f32 to vector<32x2xf32>
    %25 = arith.addf %24, %23 : vector<32x2xf32>
    %26 = arith.divf %24, %25 : vector<32x2xf32>
    %c0_19 = arith.constant 0 : index
    %c0_20 = arith.constant 0 : index
    %c0_21 = arith.constant 0 : index
    %27 = vector.load %arg1[%c0_19, %c0_20, %c0_21] : memref<2x32x256xf32, #tpu.memory_space<vmem>>, vector<1x32x256xf32>
    %28 = vector.shape_cast %27 : vector<1x32x256xf32> to vector<32x256xf32>
    %29 = vector.extract_strided_slice %26 {offsets = [0, 0], sizes = [32, 1], strides = [1, 1]} : vector<32x2xf32> to vector<32x1xf32>
    %30 = vector.broadcast %29 : vector<32x1xf32> to vector<32x256xf32>
    %31 = arith.mulf %28, %30 : vector<32x256xf32>
    %c0_22 = arith.constant 0 : index
    %c0_23 = arith.constant 0 : index
    %c0_24 = arith.constant 0 : index
    %32 = vector.load %arg6[%c0_22, %c0_23, %c0_24] : memref<2x32x256xf32, #tpu.memory_space<vmem>>, vector<1x32x256xf32>
    %33 = vector.shape_cast %32 : vector<1x32x256xf32> to vector<32x256xf32>
    %34 = vector.shape_cast %31 : vector<32x256xf32> to vector<1x32x256xf32>
    tpu.vector_store %arg6[%c0_22, %c0_23, %c0_24], %34 {strides = array<i32>} : memref<2x32x256xf32, #tpu.memory_space<vmem>>, vector<1x32x256xf32>,
    %c1_25 = arith.constant 1 : index
    %c0_26 = arith.constant 0 : index
    %c0_27 = arith.constant 0 : index
    %35 = vector.load %arg1[%c1_25, %c0_26, %c0_27] : memref<2x32x256xf32, #tpu.memory_space<vmem>>, vector<1x32x256xf32>
    %36 = vector.shape_cast %35 : vector<1x32x256xf32> to vector<32x256xf32>
    %37 = vector.extract_strided_slice %26 {offsets = [0, 1], sizes = [32, 1], strides = [1, 1]} : vector<32x2xf32> to vector<32x1xf32>
    %38 = vector.broadcast %37 : vector<32x1xf32> to vector<32x256xf32>
    %39 = arith.mulf %36, %38 : vector<32x256xf32>
    %c1_28 = arith.constant 1 : index
    %c0_29 = arith.constant 0 : index
    %c0_30 = arith.constant 0 : index
    %40 = vector.load %arg6[%c1_28, %c0_29, %c0_30] : memref<2x32x256xf32, #tpu.memory_space<vmem>>, vector<1x32x256xf32>
    %41 = vector.shape_cast %40 : vector<1x32x256xf32> to vector<32x256xf32>
    %42 = vector.shape_cast %39 : vector<32x256xf32> to vector<1x32x256xf32>
    tpu.vector_store %arg6[%c1_28, %c0_29, %c0_30], %42 {strides = array<i32>} : memref<2x32x256xf32, #tpu.memory_space<vmem>>, vector<1x32x256xf32>,
    return
  }
  func.func @transform_0(%arg0: i32) -> (i32, i32, i32) {
    %c0_i32 = arith.constant 0 : i32
    %c0_i32_0 = arith.constant 0 : i32
    %c0_i32_1 = arith.constant 0 : i32
    return %arg0, %c0_i32, %c0_i32_0 : i32, i32, i32
  }
  func.func @transform_1(%arg0: i32) -> (i32, i32) {
    %c0_i32 = arith.constant 0 : i32
    %c0_i32_0 = arith.constant 0 : i32
    %c0_i32_1 = arith.constant 0 : i32
    return %c0_i32, %c0_i32_0 : i32, i32
  }
  func.func @transform_2(%arg0: i32) -> (i32, i32) {
    %c0_i32 = arith.constant 0 : i32
    %c0_i32_0 = arith.constant 0 : i32
    %c0_i32_1 = arith.constant 0 : i32
    return %c0_i32, %c0_i32_0 : i32, i32
  }
  func.func @transform_3(%arg0: i32) -> (i32, i32) {
    %c0_i32 = arith.constant 0 : i32
    %c0_i32_0 = arith.constant 0 : i32
    %c0_i32_1 = arith.constant 0 : i32
    return %c0_i32, %c0_i32_0 : i32, i32
  }
  func.func @transform_4(%arg0: i32) -> (i32, i32) {
    %c0_i32 = arith.constant 0 : i32
    %c0_i32_0 = arith.constant 0 : i32
    %c0_i32_1 = arith.constant 0 : i32
    return %c0_i32, %c0_i32_0 : i32, i32
  }
  func.func @transform_5(%arg0: i32) -> (i32, i32, i32) {
    %c0_i32 = arith.constant 0 : i32
    %c0_i32_0 = arith.constant 0 : i32
    %c0_i32_1 = arith.constant 0 : i32
    return %arg0, %c0_i32, %c0_i32_0 : i32, i32, i32
  }
}

</mosaic_0001>

<bundles_post_ra>
// kernel: se_layer.1
= control target key start
LH: loop header
LB: loop body
LE: loop exit
PB: predicated region body
PF: predicated region fallthrough
CT: control target
= control target key end

     0   :  { %s837_s18 = smov 0   ;;  %s1063_s0 = inlined_call_operand.vmem [shape: f32[4,32,256], index: 0, kind: input, shape index: {}]   ;;  %s1064_s1 = inlined_call_operand.vmem [shape: f32[2,32], index: 1, kind: input, shape index: {}]   ;;  %s1065_s2 = inlined_call_operand.vmem [shape: f32[2,1], index: 2, kind: input, shape index: {}]   ;;  %s1066_s3 = inlined_call_operand.vmem [shape: f32[32,2], index: 3, kind: input, shape index: {}]   ;;  %s1067_s4 = inlined_call_operand.vmem [shape: f32[32,1], index: 4, kind: input, shape index: {}]   ;;  %s1068_s5 = inlined_call_operand.vmem [shape: f32[4,32,256], index: 5, kind: output, shape index: {}]  }
   0x1 LB: > { %s708_s19 = sadd.s32 4294967295, %s801_s18   ;;  %p712_p0 = scmp.ge.s32.totalorder %s801_s18, 1  ;;  %s801_s18 = sphi %s837_s18, %s15_s18  }
   0x2   : > { %p189_p1 = scmp.lt.s32.totalorder %s801_s18, 3 }
   0x4   : > { %p190_p2 = pnand %p712_p0, %p189_p1 }
   0x5   : > { %s713_s20 = sshll.u32 (!%p190_p2), %s708_s19, 1  ;;  %s804_s25 = smov (!%p190_p2), 1  }
   0x6   : > { %193 = sbr.rel (%p190_p2) target bundleno = 762 (0x2fa), region = 40  ;;  %p220_p3 = scmp.lt.s32.totalorder (!%p190_p2), %s713_s20, 3 }
   0xb   : > { %v803_v0 = vmov 1.0   ;;  %s1070_s20 = smov (!%p220_p3, %s713_s20), 3  ;;  %v396_v35 = vld [vmem:[%s1065_s2] sm:$0x3]  ;;  %v805_v36 = vmov 0   ;;  %vm382_vm0 = vcmask 7168  }
   0xc   : > { %308 = vmatpush.msra.mxu2 %v803_v0  ;;  %337 = vmatpush.msra.mxu3 %v803_v0  ;;  %s755_s21 = sshll.u32 %s1070_s20, 6  ;;  %v427_v37 = vld [vmem:[%s1067_s4] sm:$0xff]  ;;  %v430_v43 = vld [vmem:[%s1067_s4 + $0x18] sm:$0xff]  ;;  %vm402_vm1 = vcmask 261120   ;;  %v428_v58 = vld [vmem:[%s1067_s4 + $0x8] sm:$0xff]  ;;  %vm464_vm2 = vcmask 1041408  }
   0xd   : > { %241 = vmatpush.msra.mxu0 %v803_v0  ;;  %270 = vmatpush.msra.mxu1 %v803_v0  ;;  %s903_s24 = scalar_lea.vmem %s1063_s0, %s755_s21  ;;  %v391_v57 = vld [vmem:[%s1064_s1] sm:$0x3]  ;;  %v429_v59 = vld [vmem:[%s1067_s4 + $0x10] sm:$0xff]  ;;  %vm451_vm3 = vcmask 15360   ;;  %s1026_s26 = scalar_lea.vmem %s1068_s5, %s755_s21 }
   0xe   : > { %309 = vmatpush.msra.mxu2 %v803_v0  ;;  %338 = vmatpush.msra.mxu3 %v803_v0  ;;  %v914_v1 = vld [vmem:[%s903_s24 + $0x40] sm:$0xff]  ;;  %v917_v2 = vld [vmem:[%s903_s24 + $0x48] sm:$0xff]  ;;  %v936_v5 = vld [vmem:[%s903_s24 + $0x50] sm:$0xff] }
   0xf   : > { %242 = vmatpush.msra.mxu0 %v803_v0  ;;  %271 = vmatpush.msra.mxu1 %v803_v0  ;;  %v924_v3 = vld [vmem:[%s903_s24] sm:$0xff]  ;;  %v927_v4 = vld [vmem:[%s903_s24 + $0x8] sm:$0xff]  ;;  %v939_v6 = vld [vmem:[%s903_s24 + $0x58] sm:$0xff] }
  0x10   : > { %310 = vmatpush.msra.mxu2 %v803_v0  ;;  %339 = vmatpush.msra.mxu3 %v803_v0  ;;  %v942_v7 = vld [vmem:[%s903_s24 + $0x10] sm:$0xff]  ;;  %v945_v8 = vld [vmem:[%s903_s24 + $0x18] sm:$0xff]  ;;  %v952_v9 = vld [vmem:[%s903_s24 + $0x60] sm:$0xff] }
  0x11   : > { %243 = vmatpush.msra.mxu0 %v803_v0  ;;  %272 = vmatpush.msra.mxu1 %v803_v0  ;;  %v955_v10 = vld [vmem:[%s903_s24 + $0x68] sm:$0xff]  ;;  %v960_v11 = vld [vmem:[%s903_s24 + $0x70] sm:$0xff]  ;;  %v963_v12 = vld [vmem:[%s903_s24 + $0x78] sm:$0xff] }
  0x12   : > { %311 = vmatpush.msra.mxu2 %v803_v0  ;;  %340 = vmatpush.msra.mxu3 %v803_v0  ;;  %v968_v13 = vld [vmem:[%s903_s24 + $0x20] sm:$0xff]  ;;  %v971_v14 = vld [vmem:[%s903_s24 + $0x28] sm:$0xff]  ;;  %v976_v15 = vld [vmem:[%s903_s24 + $0x30] sm:$0xff] }
  0x13   : > { %244 = vmatpush.msra.mxu0 %v803_v0  ;;  %273 = vmatpush.msra.mxu1 %v803_v0  ;;  %v979_v16 = vld [vmem:[%s903_s24 + $0x38] sm:$0xff] }
  0x14   : > { %312 = vmatpush.msra.mxu2 %v803_v0  ;;  %341 = vmatpush.msra.mxu3 %v803_v0 }
  0x15   : > { %245 = vmatpush.msra.mxu0 %v803_v0  ;;  %274 = vmatpush.msra.mxu1 %v803_v0 }
  0x16   : > { %313 = vmatpush.msra.mxu2 %v803_v0  ;;  %342 = vmatpush.msra.mxu3 %v803_v0 }
  0x17   : > { %246 = vmatpush.msra.mxu0 %v803_v0  ;;  %275 = vmatpush.msra.mxu1 %v803_v0 }
  0x18   : > { %314 = vmatpush.msra.mxu2 %v803_v0  ;;  %343 = vmatpush.msra.mxu3 %v803_v0 }
  0x19   : > { %247 = vmatpush.msra.mxu0 %v803_v0  ;;  %276 = vmatpush.msra.mxu1 %v803_v0 }
  0x1a   : > { %315 = vmatpush.msra.mxu2 %v803_v0  ;;  %344 = vmatpush.msra.mxu3 %v803_v0 }
  0x1b   : > { %248 = vmatpush.msra.mxu0 %v803_v0  ;;  %277 = vmatpush.msra.mxu1 %v803_v0 }
  0x1c   : > { %316 = vmatpush.msra.mxu2 %v803_v0  ;;  %345 = vmatpush.msra.mxu3 %v803_v0 }
  0x1d   : > { %249 = vmatpush.msra.mxu0 %v803_v0  ;;  %278 = vmatpush.msra.mxu1 %v803_v0 }
  0x1e   : > { %317 = vmatpush.msra.mxu2 %v803_v0  ;;  %346 = vmatpush.msra.mxu3 %v803_v0 }
  0x1f   : > { %250 = vmatpush.msra.mxu0 %v803_v0  ;;  %279 = vmatpush.msra.mxu1 %v803_v0 }
  0x20   : > { %318 = vmatpush.msra.mxu2 %v803_v0  ;;  %347 = vmatpush.msra.mxu3 %v803_v0 }
  0x21   : > { %251 = vmatpush.msra.mxu0 %v803_v0  ;;  %280 = vmatpush.msra.mxu1 %v803_v0 }
  0x22   : > { %319 = vmatpush.msra.mxu2 %v803_v0  ;;  %348 = vmatpush.msra.mxu3 %v803_v0 }
  0x23   : > { %252 = vmatpush.msra.mxu0 %v803_v0  ;;  %281 = vmatpush.msra.mxu1 %v803_v0 }
  0x24   : > { %320 = vmatpush.msra.mxu2 %v803_v0  ;;  %349 = vmatpush.msra.mxu3 %v803_v0 }
  0x25   : > { %253 = vmatpush.msra.mxu0 %v803_v0  ;;  %282 = vmatpush.msra.mxu1 %v803_v0 }
  0x26   : > { %321 = vmatpush.msra.mxu2 %v803_v0  ;;  %350 = vmatpush.msra.mxu3 %v803_v0 }
  0x27   : > { %254 = vmatpush.msra.mxu0 %v803_v0  ;;  %283 = vmatpush.msra.mxu1 %v803_v0 }
  0x28   : > { %322 = vmatpush.msra.mxu2 %v803_v0  ;;  %351 = vmatpush.msra.mxu3 %v803_v0 }
  0x29   : > { %255 = vmatpush.msra.mxu0 %v803_v0  ;;  %284 = vmatpush.msra.mxu1 %v803_v0 }
  0x2a   : > { %323 = vmatpush.msra.mxu2 %v803_v0  ;;  %352 = vmatpush.msra.mxu3 %v803_v0 }
  0x2b   : > { %324 = vmatmul.f32.vlgmr.msra.gmra.mxu2 %v914_v1  ;;  %353 = vmatmul.f32.vlgmr.msra.gmra.mxu3 %v917_v2 }
  0x2c   : > { %256 = vmatpush.msra.mxu0 %v803_v0  ;;  %285 = vmatpush.msra.mxu1 %v803_v0  ;;  %v392_v0 = vld [vmem:[%s1066_s3] sm:$0xff] }
  0x2d   : > { %257 = vmatmul.f32.vlgmr.msra.gmra.mxu0 %v924_v3  ;;  %286 = vmatmul.f32.vlgmr.msra.gmra.mxu1 %v927_v4 }
  0x2e   : > { %771 = vset.pattern.permute.xlu2 %v805_v36  ;;  %772 = vset.pattern.permute.xlu0 %v805_v36 }
  0x2f   : > { %399 = vperm.xlu2 %771, %v396_v35   ;;  %773 = vset.pattern.permute.xlu1 %v805_v36 }
  0x33   : > { %327 = vmatmul.f32.gmra.mxu2 %v936_v5  ;;  %356 = vmatmul.f32.gmra.mxu3 %v939_v6 }
  0x35   : > { %260 = vmatmul.f32.gmra.mxu0 %v942_v7  ;;  %289 = vmatmul.f32.gmra.mxu1 %v945_v8 }
  0x37   : > { %433 = vperm.xlu2 %771, %v427_v37  }
  0x3b   : > { %330 = vmatmul.f32.gmra.mxu2 %v952_v9  ;;  %359 = vmatmul.f32.gmra.mxu3 %v955_v10 }
  0x3d   : > { %263 = vmatmul.f32.gmra.mxu0 %v968_v13  ;;  %292 = vmatmul.f32.gmra.mxu1 %v971_v14 }
  0x3f   : > { %448 = vperm.xlu2 %771, %v430_v43  }
  0x43   : > { %333 = vmatmul.f32.gmra.mxu2 %v960_v11  ;;  %362 = vmatmul.f32.gmra.mxu3 %v963_v12 }
  0x45   : > { %266 = vmatmul.f32.gmra.mxu0 %v976_v15  ;;  %295 = vmatmul.f32.gmra.mxu1 %v979_v16 }
  0x89   : > { %v400_v60 = vpop.permute.xlu2 %399 }
  0xaa   : > { %v258_v29 = vpop.f32.mrf.mxu0  ;;  %v287_v30 = vpop.f32.mrf.mxu1 }
  0xab   : > { %v288_v50 = vadd.f32 %v287_v30, %v258_v29 }
  0xae   : > { %v325_v17 = vpop.f32.mrf.mxu2  ;;  %v354_v18 = vpop.f32.mrf.mxu3 }
  0xaf   : > { %v355_v24 = vadd.f32 %v354_v18, %v325_v17  ;;  %v393_v17 = vld [vmem:[%s1066_s3 + $0x8] sm:$0xff]  ;;  %v395_v18 = vld [vmem:[%s1066_s3 + $0x18] sm:$0xff] }
  0xb2   : > { %v261_v31 = vpop.f32.mrf.mxu0  ;;  %v290_v32 = vpop.f32.mrf.mxu1 }
  0xb3   : > { %v291_v46 = vadd.f32 %v290_v32, %v261_v31 }
  0xb6   : > { %v328_v19 = vpop.f32.mrf.mxu2  ;;  %v357_v20 = vpop.f32.mrf.mxu3 }
  0xb7   : > { %v358_v21 = vadd.f32 %v357_v20, %v328_v19  ;;  %v394_v19 = vld [vmem:[%s1066_s3 + $0x10] sm:$0xff]  ;;  %v434_v20 = vpop.permute.xlu2 %433 }
  0xb9   : > { %372 = vrot.lane.b32.xlu1 %v358_v21, %s804_s25  ;;  %v806_v21 = vmov 1  }
  0xba   : > { %v264_v33 = vpop.f32.mrf.mxu0  ;;  %v293_v34 = vpop.f32.mrf.mxu1  ;;  %774 = vset.pattern.permute.xlu2 %v806_v21 }
  0xbb   : > { %v294_v47 = vadd.f32 %v293_v34, %v264_v33 }
  0xbe   : > { %v331_v22 = vpop.f32.mrf.mxu2  ;;  %v360_v23 = vpop.f32.mrf.mxu3 }
  0xbf   : > { %v361_v28 = vadd.f32 %v360_v23, %v331_v22 }
  0xc1   : > { %370 = vrot.lane.b32.xlu1 %v355_v24, %s804_s25 }
  0xc2   : > { %v267_v38 = vpop.f32.mrf.mxu0  ;;  %v296_v39 = vpop.f32.mrf.mxu1 }
  0xc3   : > { %v297_v40 = vadd.f32 %v296_v39, %v267_v38 }
  0xc6   : > { %v334_v25 = vpop.f32.mrf.mxu2  ;;  %v363_v26 = vpop.f32.mrf.mxu3 }
  0xc7   : > { %v364_v27 = vadd.f32 %v363_v26, %v334_v25  ;;  %v449_v26 = vpop.permute.xlu2 %448 }
  0xc9   : > { %376 = vrot.lane.b32.xlu0 %v364_v27, %s804_s25  ;;  %443 = vperm.xlu1 %773, %v429_v59  }
  0xd1   : > { %374 = vrot.lane.b32.xlu0 %v361_v28, %s804_s25 }
  0xd9   : > { %438 = vperm.xlu0 %772, %v428_v58  }
 0x12b   : > { %v373_v41 = vpop.permute.xlu1 %372 }
 0x12c   : > { %v384_v52 = vsel %vm382_vm0, %v291_v46, %v373_v41 }
 0x12d   : > { %v388_v55 = vmul.f32 0.00390625, %v384_v52 }
 0x133   : > { %v371_v48 = vpop.permute.xlu1 %370 }
 0x134   : > { %v383_v54 = vsel %vm382_vm0, %v288_v50, %v371_v48 }
 0x135   : > { %v387_v56 = vmul.f32 0.00390625, %v383_v54 }
 0x13b   : > { %v377_v42 = vpop.permute.xlu0 %376  ;;  %v444_v35 = vpop.permute.xlu1 %443 }
 0x13c   : > { %v386_v44 = vsel %vm382_vm0, %v297_v40, %v377_v42 }
 0x13d   : > { %v390_v45 = vmul.f32 0.00390625, %v386_v44 }
 0x13f   : > { %418 = vmatpush.msrb.mxu0 %v390_v45 }
 0x143   : > { %v375_v49 = vpop.permute.xlu0 %374 }
 0x144   : > { %v385_v51 = vsel %vm382_vm0, %v294_v47, %v375_v49 }
 0x145   : > { %v389_v53 = vmul.f32 0.00390625, %v385_v51 }
 0x147   : > { %419 = vmatpush.msrb.mxu0 %v389_v53 }
 0x149   : > { %420 = vmatpush.msrb.mxu0 %v388_v55 }
 0x14b   : > { %421 = vmatpush.msrb.mxu0 %v387_v56  ;;  %v439_v25 = vpop.permute.xlu0 %438 }
 0x14c   : > { %727 = vmatmul.msk.f32.vlgmr.msrb.gmra.mxu0 %vm402_vm1, %v391_v57 }
 0x1c9   : > { %v423_v61 = vpop.f32.mrf.mxu0 }
 0x1ca   : > { %v424_v62 = vadd.f32 %v423_v61, %v400_v60 }
 0x1cc   : > { %v426_v63 = vmax.f32 %v424_v62, 0.0 }
 0x1ce   : > { %728 = vmatpush.msk.msrb.mxu1 %vm464_vm2, %v426_v63  ;;  %757 = vmatpush.msk.msrb.mxu2 %vm464_vm2, %v426_v63 }
 0x1cf   : > { %758 = vmatpush.msk.msrb.mxu3 %vm464_vm2, %v426_v63  ;;  %729 = vmatmul.msk.f32.vlgmr.msrb.gmra.mxu1 %vm451_vm3, %v392_v0 }
 0x1d0   : > { %730 = vmatmul.msk.f32.vlgmr.msrb.gmra.mxu2 %vm451_vm3, %v393_v17  ;;  %732 = vmatmul.msk.f32.vlgmr.msrb.gmra.mxu3 %vm451_vm3, %v395_v18 }
 0x1d8   : > { %731 = vmatmul.msk.f32.gmra.mxu2 %vm451_vm3, %v394_v19 }
 0x24c   : > { %v485_v22 = vpop.f32.mrf.mxu1 }
 0x24d   : > { %v486_v23 = vadd.f32 %v485_v22, %v434_v20 }
 0x24f   : > { %v733_v24 = vmul.f32 -1.442695, %v486_v23 }
 0x251   : > { %779 = vpow2.f32 %v733_v24 }
 0x253   : > { %v488_v27 = vpop.f32.mrf.mxu2  ;;  %v494_v28 = vpop.f32.mrf.mxu3 }
 0x254   : > { %v495_v29 = vadd.f32 %v494_v28, %v449_v26  ;;  %v489_v30 = vadd.f32 %v488_v27, %v439_v25 }
 0x256   : > { %v736_v31 = vmul.f32 -1.442695, %v495_v29  ;;  %v734_v32 = vmul.f32 -1.442695, %v489_v30 }
 0x257   : > { %v780_v33 = vpop.eup %779 }
 0x258   : > { %v509_v34 = vadd.f32 1.0, %v780_v33  ;;  %781 = vpow2.f32 %v736_v31 }
 0x259   : > { %783 = vpow2.f32 %v734_v32 }
 0x25a   : > { %785 = vrcp.f32 %v509_v34  ;;  %v524_v47 = vand.u32 2147483648, %v509_v34  ;;  %v522_v49 = vand.u32 2147483647, %v509_v34  ;;  %vm518_vm5 = vweird.f32 %v509_v34 }
 0x25b   : > { %v491_v37 = vpop.f32.mrf.mxu2 }
 0x25c   : > { %v492_v38 = vadd.f32 %v491_v37, %v444_v35  ;;  %v525_v55 = vor.u32 1.1754944e-38, %v524_v47  ;;  %vm523_vm7 = vcmp.eq.f32.partialorder %v522_v49, 8.507059e+37 }
 0x25e   : > { %v782_v39 = vpop.eup %781  ;;  %v735_v40 = vmul.f32 -1.442695, %v492_v38 }
 0x25f   : > { %v784_v41 = vpop.eup %783  ;;  %v512_v42 = vadd.f32 1.0, %v782_v39 }
 0x260   : > { %v786_v43 = vpop.eup %785  ;;  %v510_v44 = vadd.f32 1.0, %v784_v41  ;;  %787 = vpow2.f32 %v735_v40 }
 0x261   : > { %789 = vrcp.f32 %v512_v42  ;;  %v514_v45 = vmul.f32 %v786_v43, %v509_v34  ;;  %vm519_vm4 = vweird.f32 %v786_v43  ;;  %v569_v63 = vand.u32 2147483648, %v512_v42 }
 0x262   : > { %791 = vrcp.f32 %v510_v44  ;;  %vm520_vm6 = vmor %vm518_vm5, %vm519_vm4  ;;  %v567_v0 = vand.u32 2147483647, %v512_v42  ;;  %v539_v18 = vand.u32 2147483648, %v510_v44  ;;  %vm563_vm10 = vweird.f32 %v512_v42 }
 0x263   : > { %v515_v46 = vsub.f32 1.0, %v514_v45  ;;  %v537_v20 = vand.u32 2147483647, %v510_v44  ;;  %vm533_vm12 = vweird.f32 %v510_v44  ;;  %v570_v25 = vor.u32 1.1754944e-38, %v569_v63 }
 0x264   : > { %vm568_vm14 = vcmp.eq.f32.partialorder %v567_v0, 8.507059e+37  ;;  %v540_v28 = vor.u32 1.1754944e-38, %v539_v18 }
 0x265   : > { %v516_v48 = vmul.f32 %v786_v43, %v515_v46  ;;  %vm538_vm15 = vcmp.eq.f32.partialorder %v537_v20, 8.507059e+37 }
 0x266   : > { %v788_v50 = vpop.eup %787 }
 0x267   : > { %v790_v51 = vpop.eup %789  ;;  %v511_v52 = vadd.f32 1.0, %v788_v50  ;;  %v517_v53 = vadd.f32 %v786_v43, %v516_v48 }
 0x268   : > { %v792_v54 = vpop.eup %791  ;;  %v559_v56 = vmul.f32 %v790_v51, %v512_v42  ;;  %vm564_vm8 = vweird.f32 %v790_v51 }
 0x269   : > { %793 = vrcp.f32 %v511_v52  ;;  %v521_v57 = vsel %vm520_vm6, %v786_v43, %v517_v53  ;;  %v529_v58 = vmul.f32 %v792_v54, %v510_v44  ;;  %vm534_vm9 = vweird.f32 %v792_v54  ;;  %vm565_vm11 = vmor %vm563_vm10, %vm564_vm8 }
 0x26a   : > { %v526_v59 = vsel %vm523_vm7, %v525_v55, %v521_v57  ;;  %v560_v60 = vsub.f32 1.0, %v559_v56  ;;  %vm535_vm13 = vmor %vm533_vm12, %vm534_vm9  ;;  %v554_v32 = vand.u32 2147483648, %v511_v52  ;;  %v552_v34 = vand.u32 2147483647, %v511_v52 }
 0x26b   : > { %618 = vperm.xlu2 %774, %v526_v59   ;;  %575 = vperm.xlu1 %773, %v526_v59   ;;  %v530_v61 = vsub.f32 1.0, %v529_v58  ;;  %vm548_vm1 = vweird.f32 %v511_v52 }
 0x26c   : > { %v561_v62 = vmul.f32 %v790_v51, %v560_v60  ;;  %v555_v37 = vor.u32 1.1754944e-38, %v554_v32  ;;  %vm553_vm3 = vcmp.eq.f32.partialorder %v552_v34, 8.507059e+37 }
 0x26d   : > { %v531_v17 = vmul.f32 %v792_v54, %v530_v61 }
 0x26e   : > { %v562_v19 = vadd.f32 %v790_v51, %v561_v62 }
 0x26f   : > { %v794_v22 = vpop.eup %793  ;;  %v532_v23 = vadd.f32 %v792_v54, %v531_v17 }
 0x270   : > { %v566_v24 = vsel %vm565_vm11, %v790_v51, %v562_v19  ;;  %v544_v26 = vmul.f32 %v794_v22, %v511_v52  ;;  %vm549_vm0 = vweird.f32 %v794_v22 }
 0x271   : > { %v536_v27 = vsel %vm535_vm13, %v792_v54, %v532_v23  ;;  %v571_v29 = vsel %vm568_vm14, %v570_v25, %v566_v24  ;;  %vm550_vm2 = vmor %vm548_vm1, %vm549_vm0 }
 0x272   : > { %v545_v30 = vsub.f32 1.0, %v544_v26  ;;  %v541_v31 = vsel %vm538_vm15, %v540_v28, %v536_v27 }
 0x273   : > { %775 = vset.pattern.permute.xlu2 %v805_v36  ;;  %590 = vperm.xlu1 %773, %v571_v29  }
 0x274   : > { %580 = vperm.xlu2 %775, %v541_v31   ;;  %v546_v33 = vmul.f32 %v794_v22, %v545_v30 }
 0x276   : > { %v547_v35 = vadd.f32 %v794_v22, %v546_v33 }
 0x278   : > { %v551_v38 = vsel %vm550_vm2, %v794_v22, %v547_v35 }
 0x279   : > { %v556_v39 = vsel %vm553_vm3, %v555_v37, %v551_v38 }
 0x27a   : > { %585 = vperm.xlu0 %772, %v556_v39  }
 0x27b   : > { %777 = vset.pattern.permute.xlu1 %v806_v21 }
 0x27c   : > { %778 = vset.pattern.permute.xlu2 %v806_v21  ;;  %626 = vperm.xlu1 %777, %v556_v39  }
 0x27d   : > { %630 = vperm.xlu2 %778, %v571_v29  }
 0x282   : > { %776 = vset.pattern.permute.xlu0 %v806_v21 }
 0x283   : > { %622 = vperm.xlu0 %776, %v541_v31  }
 0x2c5   : > { %v619_v36 = vpop.permute.xlu2 %618 }
 0x2c6   : > { %v633_v45 = vmul.f32 %v914_v1, %v619_v36  ;;  %v634_v46 = vmul.f32 %v917_v2, %v619_v36 }
 0x2c8   : > { %745 = vst [vmem:[%s1026_s26 + $0x40] sm:$0xff] %v633_v45 }
 0x2c9   : > { %746 = vst [vmem:[%s1026_s26 + $0x48] sm:$0xff] %v634_v46 }
 0x2ce   : > { %v581_v40 = vpop.permute.xlu2 %580 }
 0x2cf   : > { %v595_v41 = vmul.f32 %v581_v40, %v942_v7  ;;  %v596_v42 = vmul.f32 %v581_v40, %v945_v8 }
 0x2d1   : > { %603 = vst [vmem:[%s1026_s26 + $0x10] sm:$0xff] %v595_v41 }
 0x2d2   : > { %604 = vst [vmem:[%s1026_s26 + $0x18] sm:$0xff] %v596_v42 }
 0x2d7   : > { %v631_v7 = vpop.permute.xlu2 %630 }
 0x2d8   : > { %v640_v1 = vmul.f32 %v963_v12, %v631_v7 }
 0x2da   : > { %752 = vst [vmem:[%s1026_s26 + $0x78] sm:$0xff] %v640_v1 }
 0x2dd   : > { %v576_v21 = vpop.permute.xlu1 %575 }
 0x2de   : > { %v593_v43 = vmul.f32 %v576_v21, %v924_v3  ;;  %v594_v44 = vmul.f32 %v576_v21, %v927_v4  ;;  %v639_v4 = vmul.f32 %v960_v11, %v631_v7 }
 0x2e0   : > { %601 = vst [vmem:[%s1026_s26] sm:$0xff] %v593_v43 }
 0x2e1   : > { %602 = vst [vmem:[%s1026_s26 + $0x8] sm:$0xff] %v594_v44 }
 0x2e2   : > { %751 = vst [vmem:[%s1026_s26 + $0x70] sm:$0xff] %v639_v4 }
 0x2e5   : > { %v591_v8 = vpop.permute.xlu1 %590 }
 0x2e6   : > { %v599_v47 = vmul.f32 %v591_v8, %v976_v15  ;;  %v600_v3 = vmul.f32 %v591_v8, %v979_v16 }
 0x2e8   : > { %607 = vst [vmem:[%s1026_s26 + $0x30] sm:$0xff] %v599_v47 }
 0x2e9   : > { %608 = vst [vmem:[%s1026_s26 + $0x38] sm:$0xff] %v600_v3 }
 0x2ec   : > { %v586_v2 = vpop.permute.xlu0 %585 }
 0x2ed   : > { %v597_v48 = vmul.f32 %v586_v2, %v968_v13  ;;  %v598_v49 = vmul.f32 %v586_v2, %v971_v14 }
 0x2ee   : > { %v627_v15 = vpop.permute.xlu1 %626 }
 0x2ef   : > { %605 = vst [vmem:[%s1026_s26 + $0x20] sm:$0xff] %v597_v48  ;;  %v637_v16 = vmul.f32 %v952_v9, %v627_v15  ;;  %v638_v50 = vmul.f32 %v955_v10, %v627_v15 }
 0x2f0   : > { %606 = vst [vmem:[%s1026_s26 + $0x28] sm:$0xff] %v598_v49 }
 0x2f1   : > { %749 = vst [vmem:[%s1026_s26 + $0x60] sm:$0xff] %v637_v16 }
 0x2f2   : > { %750 = vst [vmem:[%s1026_s26 + $0x68] sm:$0xff] %v638_v50 }
 0x2f5   : > { %v623_v11 = vpop.permute.xlu0 %622 }
 0x2f6   : > { %v635_v12 = vmul.f32 %v936_v5, %v623_v11  ;;  %v636_v51 = vmul.f32 %v939_v6, %v623_v11 }
 0x2f8   : > { %747 = vst [vmem:[%s1026_s26 + $0x50] sm:$0xff] %v635_v12 }
 0x2f9   : > { %748 = vst [vmem:[%s1026_s26 + $0x58] sm:$0xff] %v636_v51 }
 0x2fa PF: > { %s15_s18 = sadd.s32 1, %s801_s18  }
 0x2fb   : > { %p12_p4 = scmp.ge.s32.totalorder %s15_s18, 4  }
 0x2fd   :  { %14 = sbr.rel (!%p12_p4) target bundleno = 1 (0x1), region = 72 }

</bundles_post_ra>
